<compile_context>
chip_gen: v7x
topology: tpu7x:2x2x1
jax: 0.10.0
libtpu: 0.0.40
codegen_flags: <defaults>
</compile_context>

<pallas_src>
import jax
import jax.numpy as jnp
from jax.experimental import pallas as pl
from jax.experimental.pallas import tpu as pltpu

LANE = 128      # vreg lane width (last dim)
SUBLANE = 8     # f32 sublane count (second-to-last dim)


def _round_up(x, m):
    return ((x + m - 1) // m) * m


def mlp_kernel(x_ref, w1_ref, b1_ref, w2_ref, b2_ref, w3_ref, b3_ref, o_ref):
    # x_ref: (tile_b, in_p) bf16 — one batch tile. Weights bf16, biases f32.
    x = x_ref[...]

    # fc1 + relu (accumulate in f32, feed next MXU op in bf16)
    h = jnp.dot(x, w1_ref[...], preferred_element_type=jnp.float32) + b1_ref[...]
    h = jnp.maximum(h, 0.0).astype(jnp.bfloat16)

    # fc2 + relu
    h = jnp.dot(h, w2_ref[...], preferred_element_type=jnp.float32) + b2_ref[...]
    h = jnp.maximum(h, 0.0).astype(jnp.bfloat16)

    # out (no activation)
    y = jnp.dot(h, w3_ref[...], preferred_element_type=jnp.float32) + b3_ref[...]
    o_ref[...] = y.astype(o_ref.dtype)


def mlp_forward(x, params, *, tile_b=256):
    """Fused MLP forward. x: (B, in_features) f32. Returns (B, out_features) f32."""
    (w1, b1), (w2, b2), (w3, b3) = params
    B, in_f = x.shape
    h1 = w1.shape[1]
    h2 = w2.shape[1]
    out_f = w3.shape[1]

    # ---- lane/sublane-friendly padded sizes (wrapper-side plumbing only) ----
    in_p = _round_up(in_f, LANE)
    h1_p = _round_up(h1, LANE)
    h2_p = _round_up(h2, LANE)
    out_p = _round_up(out_f, LANE)

    # Batch tile: fixed, sublane-aligned, never larger than the (padded) batch.
    tile_b = _round_up(max(1, min(tile_b, _round_up(B, SUBLANE))), SUBLANE)
    B_p = _round_up(B, tile_b)
    grid = (B_p // tile_b,)

    # ---- cast MXU operands to bf16, zero-pad to lane-dense shapes ----
    x_p = jnp.pad(x.astype(jnp.bfloat16), ((0, B_p - B), (0, in_p - in_f)))
    w1_p = jnp.pad(w1.astype(jnp.bfloat16), ((0, in_p - in_f), (0, h1_p - h1)))
    w2_p = jnp.pad(w2.astype(jnp.bfloat16), ((0, h1_p - h1), (0, h2_p - h2)))
    w3_p = jnp.pad(w3.astype(jnp.bfloat16), ((0, h2_p - h2), (0, out_p - out_f)))
    # Biases stay f32 (added after the f32 accumulation); kept 2D (1, features).
    b1_p = jnp.pad(b1.astype(jnp.float32), (0, h1_p - h1)).reshape(1, h1_p)
    b2_p = jnp.pad(b2.astype(jnp.float32), (0, h2_p - h2)).reshape(1, h2_p)
    b3_p = jnp.pad(b3.astype(jnp.float32), (0, out_p - out_f)).reshape(1, out_p)

    # ---- advisory cost estimate for XLA's scheduler ----
    flops = 2 * B_p * (in_p * h1_p + h1_p * h2_p + h2_p * out_p)
    bytes_accessed = (
        x_p.size * 2
        + (w1_p.size + w2_p.size + w3_p.size) * 2
        + (b1_p.size + b2_p.size + b3_p.size) * 4
        + B_p * out_p * 4
    )
    cost = pl.CostEstimate(flops=flops, transcendentals=0, bytes_accessed=bytes_accessed)

    out_padded = pl.pallas_call(
        mlp_kernel,
        out_shape=jax.ShapeDtypeStruct((B_p, out_p), jnp.float32),
        grid_spec=pltpu.PrefetchScalarGridSpec(
            num_scalar_prefetch=0,
            grid=grid,
            in_specs=[
                pl.BlockSpec((tile_b, in_p), lambda i: (i, 0)),   # x tile over batch
                pl.BlockSpec((in_p, h1_p), lambda i: (0, 0)),     # w1 (grid-invariant)
                pl.BlockSpec((1, h1_p), lambda i: (0, 0)),        # b1
                pl.BlockSpec((h1_p, h2_p), lambda i: (0, 0)),     # w2
                pl.BlockSpec((1, h2_p), lambda i: (0, 0)),        # b2
                pl.BlockSpec((h2_p, out_p), lambda i: (0, 0)),    # w3
                pl.BlockSpec((1, out_p), lambda i: (0, 0)),       # b3
            ],
            out_specs=pl.BlockSpec((tile_b, out_p), lambda i: (i, 0)),
        ),
        compiler_params=pltpu.CompilerParams(
            dimension_semantics=("parallel",),
        ),
        cost_estimate=cost,
    )(x_p, w1_p, b1_p, w2_p, b2_p, w3_p, b3_p)

    # Strip batch / feature padding.
    return out_padded[:B, :out_f]


def init_linear(key, fan_in, fan_out):
    """Deterministic init matching nn.Linear's U(-1/sqrt(fan_in), 1/sqrt(fan_in))."""
    kw, kb = jax.random.split(key)
    bound = 1.0 / jnp.sqrt(fan_in)
    # stored (in, out) — transpose of PyTorch's (out, in) weight
    w = jax.random.uniform(kw, (fan_in, fan_out), jnp.float32, -bound, bound)
    b = jax.random.uniform(kb, (fan_out,), jnp.float32, -bound, bound)
    return w, b


def reference_forward(x, params):
    (w1, b1), (w2, b2), (w3, b3) = params
    h = jnp.maximum(x @ w1 + b1, 0.0)
    h = jnp.maximum(h @ w2 + b2, 0.0)
    return h @ w3 + b3


if __name__ == "__main__":
    in_features, h1, h2, out_features = 4, 8, 9, 3
    batch = 64          # small, but >1 grid step with tile_b=16 below

    key = jax.random.PRNGKey(0)
    k_x, k1, k2, k3 = jax.random.split(key, 4)

    params = (
        init_linear(k1, in_features, h1),
        init_linear(k2, h1, h2),
        init_linear(k3, h2, out_features),
    )
    x = jax.random.normal(k_x, (batch, in_features), jnp.float32)

    fwd = jax.jit(lambda xx: mlp_forward(xx, params, tile_b=16))  # 4-step batch grid
    y = jax.block_until_ready(fwd(x))

    y_ref = reference_forward(x, params)  # full-f32 reference (module semantics)
    assert y.shape == (batch, out_features)
    # bf16 MXU operands -> tolerate small quantization error vs the f32 reference.
    assert jnp.allclose(y, y_ref, atol=6e-2, rtol=6e-2), "Pallas kernel mismatch vs reference"

    print("KERNEL_OK")
</pallas_src>

<mosaic_0001>
module attributes {stable_mosaic.version = 11 : i64} {
  func.func @mlp_kernel(%arg0: i32, %arg1: memref<16x128xbf16, #tpu.memory_space<vmem>>, %arg2: memref<128x128xbf16, #tpu.memory_space<vmem>>, %arg3: memref<1x128xf32, #tpu.memory_space<vmem>>, %arg4: memref<128x128xbf16, #tpu.memory_space<vmem>>, %arg5: memref<1x128xf32, #tpu.memory_space<vmem>>, %arg6: memref<128x128xbf16, #tpu.memory_space<vmem>>, %arg7: memref<1x128xf32, #tpu.memory_space<vmem>>, %arg8: memref<16x128xf32, #tpu.memory_space<vmem>>) attributes {dimension_semantics = [#tpu.dimension_semantics<parallel>], iteration_bounds = array<i64: 4>, scalar_prefetch = 0 : i64, scratch_operands = 0 : i64, tpu.core_type = #tpu.core_type<tc>, window_params = [{transform_indices = @transform_0, window_bounds = array<i64: 16, 128>}, {pipeline_mode = #tpu.pipeline_mode<synchronous>, transform_indices = @transform_1, window_bounds = array<i64: 128, 128>}, {pipeline_mode = #tpu.pipeline_mode<synchronous>, transform_indices = @transform_2, window_bounds = array<i64: 1, 128>}, {pipeline_mode = #tpu.pipeline_mode<synchronous>, transform_indices = @transform_3, window_bounds = array<i64: 128, 128>}, {pipeline_mode = #tpu.pipeline_mode<synchronous>, transform_indices = @transform_4, window_bounds = array<i64: 1, 128>}, {pipeline_mode = #tpu.pipeline_mode<synchronous>, transform_indices = @transform_5, window_bounds = array<i64: 128, 128>}, {pipeline_mode = #tpu.pipeline_mode<synchronous>, transform_indices = @transform_6, window_bounds = array<i64: 1, 128>}, {transform_indices = @transform_7, window_bounds = array<i64: 16, 128>}]} {
    %c0 = arith.constant 0 : index
    %c0_0 = arith.constant 0 : index
    %0 = vector.load %arg1[%c0, %c0_0] : memref<16x128xbf16, #tpu.memory_space<vmem>>, vector<16x128xbf16>
    %c0_1 = arith.constant 0 : index
    %c0_2 = arith.constant 0 : index
    %1 = vector.load %arg2[%c0_1, %c0_2] : memref<128x128xbf16, #tpu.memory_space<vmem>>, vector<128x128xbf16>
    %cst = arith.constant dense<0.000000e+00> : vector<16x128xf32>
    %2 = tpu.matmul %0, %1, %cst {dimension_numbers = #tpu.dot_dimension_numbers<[1], [0], [0], [1], [0, 0, 1, 1], [], []>} : vector<16x128xbf16>, vector<128x128xbf16>, vector<16x128xf32> -> vector<16x128xf32>
    %c0_3 = arith.constant 0 : index
    %c0_4 = arith.constant 0 : index
    %3 = vector.load %arg3[%c0_3, %c0_4] : memref<1x128xf32, #tpu.memory_space<vmem>>, vector<1x128xf32>
    %4 = vector.broadcast %3 : vector<1x128xf32> to vector<16x128xf32>
    %5 = arith.addf %2, %4 : vector<16x128xf32>
    %cst_5 = arith.constant 0.000000e+00 : f32
    %6 = vector.broadcast %cst_5 : f32 to vector<16x128xf32>
    %7 = arith.maximumf %5, %6 : vector<16x128xf32>
    %8 = arith.truncf %7 : vector<16x128xf32> to vector<16x128xbf16>
    %c0_6 = arith.constant 0 : index
    %c0_7 = arith.constant 0 : index
    %9 = vector.load %arg4[%c0_6, %c0_7] : memref<128x128xbf16, #tpu.memory_space<vmem>>, vector<128x128xbf16>
    %cst_8 = arith.constant dense<0.000000e+00> : vector<16x128xf32>
    %10 = tpu.matmul %8, %9, %cst_8 {dimension_numbers = #tpu.dot_dimension_numbers<[1], [0], [0], [1], [0, 0, 1, 1], [], []>} : vector<16x128xbf16>, vector<128x128xbf16>, vector<16x128xf32> -> vector<16x128xf32>
    %c0_9 = arith.constant 0 : index
    %c0_10 = arith.constant 0 : index
    %11 = vector.load %arg5[%c0_9, %c0_10] : memref<1x128xf32, #tpu.memory_space<vmem>>, vector<1x128xf32>
    %12 = vector.broadcast %11 : vector<1x128xf32> to vector<16x128xf32>
    %13 = arith.addf %10, %12 : vector<16x128xf32>
    %cst_11 = arith.constant 0.000000e+00 : f32
    %14 = vector.broadcast %cst_11 : f32 to vector<16x128xf32>
    %15 = arith.maximumf %13, %14 : vector<16x128xf32>
    %16 = arith.truncf %15 : vector<16x128xf32> to vector<16x128xbf16>
    %c0_12 = arith.constant 0 : index
    %c0_13 = arith.constant 0 : index
    %17 = vector.load %arg6[%c0_12, %c0_13] : memref<128x128xbf16, #tpu.memory_space<vmem>>, vector<128x128xbf16>
    %cst_14 = arith.constant dense<0.000000e+00> : vector<16x128xf32>
    %18 = tpu.matmul %16, %17, %cst_14 {dimension_numbers = #tpu.dot_dimension_numbers<[1], [0], [0], [1], [0, 0, 1, 1], [], []>} : vector<16x128xbf16>, vector<128x128xbf16>, vector<16x128xf32> -> vector<16x128xf32>
    %c0_15 = arith.constant 0 : index
    %c0_16 = arith.constant 0 : index
    %19 = vector.load %arg7[%c0_15, %c0_16] : memref<1x128xf32, #tpu.memory_space<vmem>>, vector<1x128xf32>
    %20 = vector.broadcast %19 : vector<1x128xf32> to vector<16x128xf32>
    %21 = arith.addf %18, %20 : vector<16x128xf32>
    %c0_17 = arith.constant 0 : index
    %c0_18 = arith.constant 0 : index
    %22 = vector.load %arg8[%c0_17, %c0_18] : memref<16x128xf32, #tpu.memory_space<vmem>>, vector<16x128xf32>
    tpu.vector_store %arg8[%c0_17, %c0_18], %21 {strides = array<i32>} : memref<16x128xf32, #tpu.memory_space<vmem>>, vector<16x128xf32>,
    return
  }
  func.func @transform_0(%arg0: i32) -> (i32, i32) {
    %c0_i32 = arith.constant 0 : i32
    %c0_i32_0 = arith.constant 0 : i32
    return %arg0, %c0_i32 : i32, i32
  }
  func.func @transform_1(%arg0: i32) -> (i32, i32) {
    %c0_i32 = arith.constant 0 : i32
    %c0_i32_0 = arith.constant 0 : i32
    %c0_i32_1 = arith.constant 0 : i32
    return %c0_i32, %c0_i32_0 : i32, i32
  }
  func.func @transform_2(%arg0: i32) -> (i32, i32) {
    %c0_i32 = arith.constant 0 : i32
    %c0_i32_0 = arith.constant 0 : i32
    %c0_i32_1 = arith.constant 0 : i32
    return %c0_i32, %c0_i32_0 : i32, i32
  }
  func.func @transform_3(%arg0: i32) -> (i32, i32) {
    %c0_i32 = arith.constant 0 : i32
    %c0_i32_0 = arith.constant 0 : i32
    %c0_i32_1 = arith.constant 0 : i32
    return %c0_i32, %c0_i32_0 : i32, i32
  }
  func.func @transform_4(%arg0: i32) -> (i32, i32) {
    %c0_i32 = arith.constant 0 : i32
    %c0_i32_0 = arith.constant 0 : i32
    %c0_i32_1 = arith.constant 0 : i32
    return %c0_i32, %c0_i32_0 : i32, i32
  }
  func.func @transform_5(%arg0: i32) -> (i32, i32) {
    %c0_i32 = arith.constant 0 : i32
    %c0_i32_0 = arith.constant 0 : i32
    %c0_i32_1 = arith.constant 0 : i32
    return %c0_i32, %c0_i32_0 : i32, i32
  }
  func.func @transform_6(%arg0: i32) -> (i32, i32) {
    %c0_i32 = arith.constant 0 : i32
    %c0_i32_0 = arith.constant 0 : i32
    %c0_i32_1 = arith.constant 0 : i32
    return %c0_i32, %c0_i32_0 : i32, i32
  }
  func.func @transform_7(%arg0: i32) -> (i32, i32) {
    %c0_i32 = arith.constant 0 : i32
    %c0_i32_0 = arith.constant 0 : i32
    return %arg0, %c0_i32 : i32, i32
  }
}

</mosaic_0001>

<bundles_post_ra>
// kernel: _lambda_.1
= control target key start
LH: loop header
LB: loop body
LE: loop exit
PB: predicated region body
PF: predicated region fallthrough
CT: control target
= control target key end

     0   :  { %12 = vsyncpa [#allocation3], 0  ;;  %s979_s24 = smov 0   ;;  %s1132_s0 = inlined_call_operand.vmem [shape: bf16[64,128], index: 0, kind: input, shape index: {}]   ;;  %s1133_s1 = inlined_call_operand.hbm [shape: bf16[128,128], index: 1, kind: input, shape index: {}]   ;;  %s1134_s2 = inlined_call_operand.vmem [shape: f32[1,128], index: 2, kind: input, shape index: {}]   ;;  %s1135_s3 = inlined_call_operand.vmem [shape: bf16[128,128], index: 3, kind: input, shape index: {}]   ;;  %s1136_s4 = inlined_call_operand.vmem [shape: f32[1,128], index: 4, kind: input, shape index: {}]   ;;  %s1137_s5 = inlined_call_operand.vmem [shape: bf16[128,128], index: 5, kind: input, shape index: {}]   ;;  %s1138_s6 = inlined_call_operand.vmem [shape: f32[1,128], index: 6, kind: input, shape index: {}]   ;;  %s1139_s7 = inlined_call_operand.vmem [shape: f32[64,128], index: 7, kind: output, shape index: {}]  }
   0x1 LB: > { %s718_s25 = sadd.s32 4294967295, %s932_s24   ;;  %p720_p0 = scmp.ge.s32.totalorder %s932_s24, 1  ;;  %s932_s24 = sphi %s979_s24, %s18_s24  }
   0x2   : > { %p201_p1 = scmp.lt.s32.totalorder %s932_s24, 5  ;;  %s934_s26 = smov [#allocation2]  }
   0x3   : > { %s213_s27 = sshll.u32 %s934_s26, 4  ;;  %p993_p3 = scmp.eq.s32.totalorder %s718_s25, 0  ;;  %s214_s27 = int_to_ptr.vmem [resolvable:$true] %s213_s27 }
   0x4   : > { %p987_p2 = pnand %p720_p0, %p201_p1  ;;  %s894_s10 = scalar_lea.hbm %s1133_s1, 1024 }
   0x5   : > { %s1144_s29 = scalar_select %p993_p3, 1, 0 }
   0x6   : > { %s1143_s28 = scalar_select %p987_p2, 1, 0 }
   0x7   : > { %p850_p4 = pneg %p987_p2  ;;  %p895_p6 = scmp.ne.s32.totalorder %s1133_s1, %s894_s10 }
   0x8   : > { %p901_p10 = scmp.lt.u32.totalorder %s894_s10, %s1133_s1 }
   0x9   : > { %p1001_p5 = pnand %p993_p3, %p850_p4 }
   0xb   : > { %p896_p7 = pneg %p1001_p5 }
   0xd   : > { %p897_p8 = pnand %p896_p7, %p895_p6 }
   0xf   : > { %p898_p9 = pneg %p897_p8 }
  0x11   : > { %p903_p11 = pnand %p901_p10, %p898_p9 }
  0x13   : > { %906 = shalt.err (!%p903_p11)
}
  0x14   : > { %s907_s15 = scalar_lea.vmem %s214_s27, 1024  ;;  %p915_p1 = scmp.lt.s32.totalorder %s214_s27, %s214_s27 }
  0x15   : > { %p908_p12 = scmp.ne.s32.totalorder %s214_s27, %s907_s15  ;;  %p916_p4 = scmp.lt.s32.totalorder %s907_s15, %s907_s15 }
  0x17   : > { %p910_p13 = pnand %p908_p12, %p896_p7  ;;  %p917_p3 = por %p916_p4, %p915_p1 }
  0x19   : > { %p911_p0 = pneg %p910_p13 }
  0x1b   : > { %p918_p2 = pnand %p917_p3, %p911_p0 }
  0x1d   : > { %921 = shalt.err (!%p918_p2)
}
  0x1e   : > { %s935_s16 = smov 64   ;;  %s936_s17 = smov 4  }
  0x1f   : > { %853 = dma.hbm_to_vmem [thread:$0]  (!%p1001_p5), %s1133_s1, 1024, %s214_s27, [#allocation3], %s935_s16, %s935_s16, %s936_s17  }
  0x20   : > { %p1146_p6 = scmp.ne.s32.totalorder %s1143_s28, 0 }
  0x21   : > { %p1147_p8 = scmp.ne.s32.totalorder (!%p1146_p6), %s1144_s29, 0 }
  0x22   : > { %253 = sbr.rel (%p1146_p6) target bundleno = 733 (0x2dd), region = 48 }
  0x29   : > { %927 = dma.done.wait (%p1147_p8), [#allocation3], 1024  }
  0x2a   : > { %929 = vsyncadd (%p1147_p8), [#allocation3], 4294966272  ;;  %s725_s20 = sshll.u32 %s718_s25, 1  ;;  %v937_v0 = vmov 0.0   ;;  %vm938_vm0 = vmmov 0   ;;  %v869_v1 = vld [vmem:[#allocation2] sm:$0xff]  }
  0x2b   : > { %786 = vmatprep.subr.bf16.mxu0 %v937_v0  ;;  %802 = vmatprep.mubr.msk.bf16.mxu0 %vm938_vm0, %v937_v0  ;;  %p286_p2 = scmp.lt.s32.totalorder %s725_s20, 7  ;;  %v870_v2 = vld [vmem:[#allocation2 + $0x8] sm:$0xff]   ;;  %v871_v3 = vld [vmem:[#allocation2 + $0x10] sm:$0xff]   ;;  %v878_v4 = vld [vmem:[%s1135_s3] sm:$0xff]  }
  0x2c   : > { %806 = vmatprep.subr.bf16.mxu1 %v937_v0  ;;  %822 = vmatprep.mubr.msk.bf16.mxu1 %vm938_vm0, %v937_v0  ;;  %v872_v5 = vld [vmem:[#allocation2 + $0x18] sm:$0xff]   ;;  %v879_v6 = vld [vmem:[%s1135_s3 + $0x8] sm:$0xff]   ;;  %v873_v7 = vld [vmem:[#allocation2 + $0x20] sm:$0xff]  }
  0x2d   : > { %s1149_s20 = smov (!%p286_p2, %s725_s20), 7  ;;  %787 = vmatpush3.bf16.msra.mxu0 %v869_v1  ;;  %807 = vmatpush3.bf16.msra.mxu1 %v878_v4  ;;  %v880_v8 = vld [vmem:[%s1135_s3 + $0x10] sm:$0xff]   ;;  %v874_v9 = vld [vmem:[#allocation2 + $0x28] sm:$0xff]   ;;  %v881_v10 = vld [vmem:[%s1135_s3 + $0x18] sm:$0xff]  }
  0x2e   : > { %788 = vmatprep.subr.bf16.mxu0 %v937_v0  ;;  %s726_s21 = sshll.u32 %s1149_s20, 2  ;;  %808 = vmatprep.subr.bf16.mxu1 %v937_v0  ;;  %v875_v11 = vld [vmem:[#allocation2 + $0x30] sm:$0xff]   ;;  %v882_v12 = vld [vmem:[%s1135_s3 + $0x20] sm:$0xff]   ;;  %v876_v13 = vld [vmem:[#allocation2 + $0x38] sm:$0xff]   ;;  %s728_s18 = sshll.u32 %s1149_s20, 3 }
  0x2f   : > { %s1043_s25 = scalar_lea.vmem %s1132_s0, %s726_s21  ;;  %v883_v14 = vld [vmem:[%s1135_s3 + $0x28] sm:$0xff]   ;;  %v884_v16 = vld [vmem:[%s1135_s3 + $0x30] sm:$0xff]   ;;  %v885_v17 = vld [vmem:[%s1135_s3 + $0x38] sm:$0xff]  }
  0x30   : > { %v877_v15 = vld [vmem:[%s1043_s25] sm:$0xff]   ;;  %v887_v19 = vld [vmem:[%s1137_s5 + $0x8] sm:$0xff]   ;;  %v888_v20 = vld [vmem:[%s1137_s5 + $0x10] sm:$0xff]   ;;  %s295_s25 = scalar_lea.vmem %s1139_s7, %s728_s18 }
  0x31   : > { %789 = vmatpush3.bf16.msra.mxu0 %v870_v2  ;;  %809 = vmatpush3.bf16.msra.mxu1 %v879_v6  ;;  %v886_v18 = vld [vmem:[%s1137_s5] sm:$0xff]   ;;  %v889_v21 = vld [vmem:[%s1137_s5 + $0x18] sm:$0xff]   ;;  %v891_v23 = vld [vmem:[%s1137_s5 + $0x28] sm:$0xff]  }
  0x32   : > { %790 = vmatprep.subr.bf16.mxu0 %v937_v0  ;;  %810 = vmatprep.subr.bf16.mxu1 %v937_v0  ;;  %v890_v22 = vld [vmem:[%s1137_s5 + $0x20] sm:$0xff]   ;;  %v892_v34 = vld [vmem:[%s1137_s5 + $0x30] sm:$0xff]   ;;  %v893_v35 = vld [vmem:[%s1137_s5 + $0x38] sm:$0xff]  }
  0x33   : > { %v729_v24 = vld [vmem:[%s1134_s2] ss:$0 sm:$0xff] }
  0x34   : > { %v739_v36 = vld [vmem:[%s1136_s4] ss:$0 sm:$0xff] }
  0x35   : > { %791 = vmatpush3.bf16.msra.mxu0 %v871_v3  ;;  %811 = vmatpush3.bf16.msra.mxu1 %v880_v8  ;;  %v748_v46 = vld [vmem:[%s1138_s6] ss:$0 sm:$0xff] }
  0x36   : > { %792 = vmatprep.subr.bf16.mxu0 %v937_v0  ;;  %812 = vmatprep.subr.bf16.mxu1 %v937_v0 }
  0x39   : > { %793 = vmatpush3.bf16.msra.mxu0 %v872_v5  ;;  %813 = vmatpush3.bf16.msra.mxu1 %v881_v10 }
  0x3a   : > { %794 = vmatprep.subr.bf16.mxu0 %v937_v0  ;;  %814 = vmatprep.subr.bf16.mxu1 %v937_v0 }
  0x3d   : > { %795 = vmatpush3.bf16.msra.mxu0 %v873_v7  ;;  %815 = vmatpush3.bf16.msra.mxu1 %v882_v12 }
  0x3e   : > { %796 = vmatprep.subr.bf16.mxu0 %v937_v0  ;;  %816 = vmatprep.subr.bf16.mxu1 %v937_v0 }
  0x41   : > { %797 = vmatpush3.bf16.msra.mxu0 %v874_v9  ;;  %817 = vmatpush3.bf16.msra.mxu1 %v883_v14 }
  0x42   : > { %798 = vmatprep.subr.bf16.mxu0 %v937_v0  ;;  %818 = vmatprep.subr.bf16.mxu1 %v937_v0 }
  0x45   : > { %799 = vmatpush3.bf16.msra.mxu0 %v875_v11  ;;  %819 = vmatpush3.bf16.msra.mxu1 %v884_v16 }
  0x46   : > { %800 = vmatprep.subr.bf16.mxu0 %v937_v0  ;;  %820 = vmatprep.subr.bf16.mxu1 %v937_v0 }
  0x49   : > { %801 = vmatpush3.bf16.msra.mxu0 %v876_v13  ;;  %821 = vmatpush3.bf16.msra.mxu1 %v885_v17 }
  0x4a   : > { %826 = vmatprep.subr.bf16.mxu0 %v937_v0 }
  0x4c   : > { %803 = vmatmul.mubr.bf16.vlgmr.msra.gmra.mrb[0].mxu0 %v877_v15 }
  0x4d   : > { %842 = vmatprep.mubr.msk.bf16.mxu0 %vm938_vm0, %v937_v0  ;;  %827 = vmatpush3.bf16.msra.mxu0 %v886_v18 }
  0x4e   : > { %828 = vmatprep.subr.bf16.mxu0 %v937_v0 }
  0x51   : > { %829 = vmatpush3.bf16.msra.mxu0 %v887_v19 }
  0x52   : > { %830 = vmatprep.subr.bf16.mxu0 %v937_v0 }
  0x55   : > { %831 = vmatpush3.bf16.msra.mxu0 %v888_v20 }
  0x56   : > { %832 = vmatprep.subr.bf16.mxu0 %v937_v0 }
  0x59   : > { %833 = vmatpush3.bf16.msra.mxu0 %v889_v21 }
  0x5a   : > { %834 = vmatprep.subr.bf16.mxu0 %v937_v0 }
  0x5d   : > { %835 = vmatpush3.bf16.msra.mxu0 %v890_v22 }
  0x5e   : > { %836 = vmatprep.subr.bf16.mxu0 %v937_v0 }
  0x61   : > { %837 = vmatpush3.bf16.msra.mxu0 %v891_v23 }
  0x62   : > { %838 = vmatprep.subr.bf16.mxu0 %v937_v0 }
  0x65   : > { %839 = vmatpush3.bf16.msra.mxu0 %v892_v34 }
  0x66   : > { %840 = vmatprep.subr.bf16.mxu0 %v937_v0 }
  0x69   : > { %841 = vmatpush3.bf16.msra.mxu0 %v893_v35 }
 0x11f   : > { %v411_v25 = vpop.f32.mrb[0].mxu0 }
 0x120   : > { %v412_v26 = vadd.f32 %v729_v24, %v411_v25  ;;  %v804_v27 = vpop.f32.mrb[1].mxu0 }
 0x121   : > { %v414_v28 = vpop.f32.mrb[2].mxu0 }
 0x122   : > { %v415_v29 = vadd.f32 %v729_v24, %v414_v28  ;;  %v805_v30 = vpop.f32.mrb[3].mxu0  ;;  %v418_v31 = vmax.f32 %v412_v26, 0.0 }
 0x124   : > { %v419_v32 = vmax.f32 %v415_v29, 0.0 }
 0x126   : > { %v420_v33 = vpack.c.bf16 %v419_v32, %v418_v31 }
 0x128   : > { %823 = vmatmul.mubr.bf16.vlgmr.msra.gmra.mrb[0].mxu1 %v420_v33 }
 0x1fb   : > { %v526_v37 = vpop.f32.mrb[0].mxu1 }
 0x1fc   : > { %v527_v38 = vadd.f32 %v739_v36, %v526_v37  ;;  %v824_v39 = vpop.f32.mrb[1].mxu1 }
 0x1fd   : > { %v529_v40 = vpop.f32.mrb[2].mxu1 }
 0x1fe   : > { %v530_v41 = vadd.f32 %v739_v36, %v529_v40  ;;  %v825_v42 = vpop.f32.mrb[3].mxu1  ;;  %v533_v43 = vmax.f32 %v527_v38, 0.0 }
 0x200   : > { %v534_v44 = vmax.f32 %v530_v41, 0.0 }
 0x202   : > { %v535_v45 = vpack.c.bf16 %v534_v44, %v533_v43 }
 0x204   : > { %843 = vmatmul.mubr.bf16.vlgmr.msra.gmra.mrb[4].mxu0 %v535_v45 }
 0x2d7   : > { %v641_v47 = vpop.f32.mrb[4].mxu0 }
 0x2d8   : > { %v642_v48 = vadd.f32 %v748_v46, %v641_v47  ;;  %v844_v49 = vpop.f32.mrb[5].mxu0 }
 0x2d9   : > { %v644_v50 = vpop.f32.mrb[6].mxu0 }
 0x2da   : > { %648 = vst [vmem:[%s295_s25] sm:$0xff] %v642_v48  ;;  %v645_v51 = vadd.f32 %v748_v46, %v644_v50  ;;  %v845_v52 = vpop.f32.mrb[7].mxu0 }
 0x2dc   : > { %649 = vst [vmem:[%s295_s25 + $0x8] sm:$0xff] %v645_v51 }
 0x2dd PF: > { %s18_s24 = sadd.s32 1, %s932_s24  }
 0x2de   : > { %p15_p3 = scmp.ge.s32.totalorder %s18_s24, 6  }
 0x2e0   :  { %17 = sbr.rel (!%p15_p3) target bundleno = 1 (0x1), region = 83 }
 0x2e7   :  { %672 = vsyncpa [#allocation3], 1 }
 0x2e8   :  { %674 = vsyncpa [#allocation3 + $0x1], 1 }

</bundles_post_ra>
